<compile_context>
chip_gen: v5e
topology: v5e:2x2
jax: 0.10.0
libtpu: 0.0.40
codegen_flags: <defaults>
</compile_context>

<pallas_src>
import jax
import jax.numpy as jnp
from jax.experimental import pallas as pl
from jax.experimental.pallas import tpu as pltpu

# ----------------------------- problem sizes ------------------------------
B = 2                    # batch (module's nominal serving shape)
C = 4                    # board channels (NCHW)
HW = 8                   # board spatial size (H == W == 8)
D_BOARD = C * HW * HW    # 256 == full MXU contraction depth on v6e/v7x
HIDDEN = 32
N_ACT = 64               # one action per board square

OUT_W = 128              # lane-dense output slab width
VALUE_LANE = N_ACT       # lane 64 holds the value head
ACTION_LANE = N_ACT + 1  # lane 65 holds the argmax action (exact in bf16 for idx<256)

MAX_TB = 1024            # per-step batch tile cap (fits VMEM on v5e/v6e/v7x:
                         # ~(1MB board + 0.25MB slab) x 2 buffers ~= 2.5MB)


# ------------------------------ Pallas kernel ------------------------------
def policy_kernel(xb_ref, xt_ref, w1b_ref, w1t_ref, b1_ref, w2v_ref, b2v_ref,
                  out_ref):
    xb = xb_ref[...]                                   # (TB, 256) f32
    xt = xt_ref[...]                                   # (TB, 1)   f32

    # Hidden layer: K=256 bf16 MXU matmul; `turn` column folded in on the VPU.
    h = jnp.dot(xb.astype(jnp.bfloat16), w1b_ref[...],
                preferred_element_type=jnp.float32)    # (TB, HIDDEN)
    h = jnp.maximum(h + xt * w1t_ref[...] + b1_ref[...], 0.0)

    # Fused logits+value head: one lane-dense (HIDDEN,128) bf16 matmul.
    out2 = jnp.dot(h.astype(jnp.bfloat16), w2v_ref[...],
                   preferred_element_type=jnp.float32) + b2v_ref[...]  # (TB,128)

    # Argmax over the real logit lanes (first-max-index wins, like torch).
    # Kept at full 128-lane width — slicing to 64 lanes would force a
    # sub-vreg layout/VMEM copy for zero gain (this work hides under the
    # HBM stream).
    lane = jax.lax.broadcasted_iota(jnp.int32, out2.shape, 1)
    logits_m = jnp.where(lane < N_ACT, out2, -jnp.inf)
    m = jnp.max(logits_m, axis=-1, keepdims=True)      # (TB, 1)
    cand = jnp.where(logits_m == m, lane, jnp.int32(OUT_W))
    action = jnp.min(cand, axis=-1, keepdims=True).astype(jnp.float32)  # (TB,1)

    # Single lane-dense slab: [logits(0:64) | value(64) | action(65) | zeros],
    # stored bf16 (action exact for idx < 256; forward only consumes action).
    slab = jnp.where(lane == ACTION_LANE, action, out2)
    out_ref[...] = slab.astype(out_ref.dtype)


# ------------------------------ tile selection ------------------------------
def _round_up(x, m):
    return -(-x // m) * m


def _choose_tb(bn: int, max_tb: int = MAX_TB) -> int:
    """Per-step batch tile: big enough to amortize step overhead, >=2 grid
    steps when the batch allows (v7x megacore), multiple of 8 (sublane)."""
    if bn <= 8:
        return bn                       # single full-array block (e.g. B=2)
    tb = min(_round_up(bn, 8), max_tb)
    if pl.cdiv(bn, tb) < 2:
        # Split into (at least) two steps so the "parallel" grid axis can land
        # on both TensorCores on v7x; harmless elsewhere.
        tb = _round_up(pl.cdiv(bn, 2), 8)
    return tb


# ------------------------------ host wrapper --------------------------------
def run_policy(board_flat, turn2d, w1b, w1t, b1, w2v, b2v):
    """board_flat: (B,256) f32, turn2d: (B,1) f32.
    Returns (action (B,) int32, logits (B,N_ACT) f32, value (B,1) f32).
    Logits/value are bf16-rounded at writeback (forward only uses action)."""
    Bn = board_flat.shape[0]
    TB = _choose_tb(Bn)
    grid = (pl.cdiv(Bn, TB),)

    slab = pl.pallas_call(
        policy_kernel,
        out_shape=jax.ShapeDtypeStruct((Bn, OUT_W), jnp.bfloat16),
        grid=grid,
        in_specs=[
            pl.BlockSpec((TB, D_BOARD), lambda i: (i, 0)),   # board features
            pl.BlockSpec((TB, 1), lambda i: (i, 0)),         # turn
            # weights/biases stay VMEM-resident across grid steps
            pl.BlockSpec(w1b.shape, lambda i: (0, 0)),
            pl.BlockSpec(w1t.shape, lambda i: (0, 0)),
            pl.BlockSpec(b1.shape, lambda i: (0, 0)),
            pl.BlockSpec(w2v.shape, lambda i: (0, 0)),
            pl.BlockSpec(b2v.shape, lambda i: (0, 0)),
        ],
        out_specs=pl.BlockSpec((TB, OUT_W), lambda i: (i, 0)),
        compiler_params=pltpu.CompilerParams(
            dimension_semantics=("parallel",)),
    )(board_flat, turn2d, w1b, w1t, b1, w2v, b2v)

    action = slab[:, ACTION_LANE].astype(jnp.int32)
    logits = slab[:, :N_ACT].astype(jnp.float32)
    value = slab[:, VALUE_LANE:VALUE_LANE + 1].astype(jnp.float32)
    return action, logits, value


def policy_wrapper_forward(board, turn, kernel_params):
    """Mirror of PolicyWrapper.forward: builds obs, runs policy, returns action."""
    # obs = {'board': board, 'turn': turn}
    board_flat = board.reshape(board.shape[0], -1).astype(jnp.float32)  # (B, 256)
    turn2d = turn.reshape(-1, 1).astype(jnp.float32)                    # (B, 1)
    outputs = run_policy(board_flat, turn2d, *kernel_params)  # (action, logits, value)
    # TODO(synk): PyTorch forward `print(outputs)` is an I/O side effect; omitted
    # so stdout stays exactly "KERNEL_OK".
    action = outputs[0]
    return action


# ----------------------------- parameter setup -----------------------------
def init_params(key):
    k1, k2, k3 = jax.random.split(key, 3)
    w1 = jax.random.normal(k1, (D_BOARD + 1, HIDDEN), jnp.float32) * 0.05
    b1 = jnp.zeros((1, HIDDEN), jnp.float32)
    w2 = jax.random.normal(k2, (HIDDEN, N_ACT), jnp.float32) * 0.05
    b2 = jnp.zeros((1, N_ACT), jnp.float32)
    wv = jax.random.normal(k3, (HIDDEN, 1), jnp.float32) * 0.05
    bv = jnp.zeros((1, 1), jnp.float32)
    return (w1, b1, w2, b2, wv, bv)


def prep_kernel_params(params):
    """Split W1 into (board, turn) parts and fuse the value head into W2."""
    w1, b1, w2, b2, wv, bv = params
    w1b = w1[:D_BOARD].astype(jnp.bfloat16)            # (256, HIDDEN) bf16 (MXU)
    w1t = w1[D_BOARD:D_BOARD + 1]                       # (1, HIDDEN)   f32  (VPU)
    w2v = jnp.zeros((HIDDEN, OUT_W), jnp.float32)
    w2v = w2v.at[:, :N_ACT].set(w2).at[:, VALUE_LANE].set(wv[:, 0])
    w2v = w2v.astype(jnp.bfloat16)                      # (HIDDEN, 128) bf16 (MXU)
    b2v = jnp.zeros((1, OUT_W), jnp.float32)
    b2v = b2v.at[:, :N_ACT].set(b2).at[:, VALUE_LANE].set(bv[:, 0])
    return (w1b, w1t, b1, w2v, b2v)


def _reference_action(board, turn, kparams):
    """Plain-JAX reference of the same (bf16-matmul) math, action only."""
    w1b, w1t, b1, w2v, b2v = kparams
    Bn = board.shape[0]
    feats = board.reshape(Bn, -1).astype(jnp.float32)
    h_ref = jnp.maximum(
        jnp.dot(feats.astype(jnp.bfloat16), w1b, preferred_element_type=jnp.float32)
        + turn.reshape(-1, 1) * w1t + b1, 0.0)
    out2_ref = jnp.dot(h_ref.astype(jnp.bfloat16), w2v,
                       preferred_element_type=jnp.float32) + b2v
    logits_ref = out2_ref[:, :N_ACT]
    return jnp.argmax(logits_ref, axis=-1).astype(jnp.int32)


if __name__ == "__main__":
    key = jax.random.PRNGKey(0)
    kb, kt, kp, kb2, kt2 = jax.random.split(key, 5)

    params = init_params(kp)
    kparams = prep_kernel_params(params)

    # --- nominal module shape: B=2 (pure launch/step overhead; one grid step) ---
    board = jax.random.normal(kb, (B, C, HW, HW), jnp.float32)   # NCHW, as in torch
    turn = jax.random.bernoulli(kt, 0.5, (B,)).astype(jnp.float32)

    action = policy_wrapper_forward(board, turn, kparams)
    jax.block_until_ready(action)

    action_ref = _reference_action(board, turn, kparams)
    assert action.shape == (B,)
    assert jnp.array_equal(action, action_ref), (action, action_ref)

    # --- large-batch path: exercises TB=1024 tiling and the 2-step grid ---
    B_BIG = 2048
    board_big = jax.random.normal(kb2, (B_BIG, C, HW, HW), jnp.float32)
    turn_big = jax.random.bernoulli(kt2, 0.5, (B_BIG,)).astype(jnp.float32)

    action_big = policy_wrapper_forward(board_big, turn_big, kparams)
    jax.block_until_ready(action_big)

    action_big_ref = _reference_action(board_big, turn_big, kparams)
    assert action_big.shape == (B_BIG,)
    assert jnp.array_equal(action_big, action_big_ref)

    print("KERNEL_OK")
</pallas_src>

<mosaic_0001>
module attributes {stable_mosaic.version = 11 : i64} {
  func.func @policy_kernel(%arg0: i32, %arg1: memref<2x256xf32, #tpu.memory_space<vmem>>, %arg2: memref<2x1xf32, #tpu.memory_space<vmem>>, %arg3: memref<256x32xbf16, #tpu.memory_space<vmem>>, %arg4: memref<1x32xf32, #tpu.memory_space<vmem>>, %arg5: memref<1x32xf32, #tpu.memory_space<vmem>>, %arg6: memref<32x128xbf16, #tpu.memory_space<vmem>>, %arg7: memref<1x128xf32, #tpu.memory_space<vmem>>, %arg8: memref<2x128xbf16, #tpu.memory_space<vmem>>) attributes {dimension_semantics = [#tpu.dimension_semantics<parallel>], iteration_bounds = array<i64: 1>, scalar_prefetch = 0 : i64, scratch_operands = 0 : i64, tpu.core_type = #tpu.core_type<tc>, window_params = [{transform_indices = @transform_0, window_bounds = array<i64: 2, 256>}, {transform_indices = @transform_1, window_bounds = array<i64: 2, 1>}, {pipeline_mode = #tpu.pipeline_mode<synchronous>, transform_indices = @transform_2, window_bounds = array<i64: 256, 32>}, {pipeline_mode = #tpu.pipeline_mode<synchronous>, transform_indices = @transform_3, window_bounds = array<i64: 1, 32>}, {pipeline_mode = #tpu.pipeline_mode<synchronous>, transform_indices = @transform_4, window_bounds = array<i64: 1, 32>}, {pipeline_mode = #tpu.pipeline_mode<synchronous>, transform_indices = @transform_5, window_bounds = array<i64: 32, 128>}, {pipeline_mode = #tpu.pipeline_mode<synchronous>, transform_indices = @transform_6, window_bounds = array<i64: 1, 128>}, {transform_indices = @transform_7, window_bounds = array<i64: 2, 128>}]} {
    %c0 = arith.constant 0 : index
    %c0_0 = arith.constant 0 : index
    %0 = vector.load %arg1[%c0, %c0_0] : memref<2x256xf32, #tpu.memory_space<vmem>>, vector<2x256xf32>
    %c0_1 = arith.constant 0 : index
    %c0_2 = arith.constant 0 : index
    %1 = vector.load %arg2[%c0_1, %c0_2] : memref<2x1xf32, #tpu.memory_space<vmem>>, vector<2x1xf32>
    %2 = arith.truncf %0 : vector<2x256xf32> to vector<2x256xbf16>
    %c0_3 = arith.constant 0 : index
    %c0_4 = arith.constant 0 : index
    %3 = vector.load %arg3[%c0_3, %c0_4] : memref<256x32xbf16, #tpu.memory_space<vmem>>, vector<256x32xbf16>
    %cst = arith.constant dense<0.000000e+00> : vector<2x32xf32>
    %4 = tpu.matmul %2, %3, %cst {dimension_numbers = #tpu.dot_dimension_numbers<[1], [0], [0], [1], [0, 0, 1, 1], [], []>} : vector<2x256xbf16>, vector<256x32xbf16>, vector<2x32xf32> -> vector<2x32xf32>
    %c0_5 = arith.constant 0 : index
    %c0_6 = arith.constant 0 : index
    %5 = vector.load %arg4[%c0_5, %c0_6] : memref<1x32xf32, #tpu.memory_space<vmem>>, vector<1x32xf32>
    %6 = vector.broadcast %1 : vector<2x1xf32> to vector<2x32xf32>
    %7 = vector.broadcast %5 : vector<1x32xf32> to vector<2x32xf32>
    %8 = arith.mulf %6, %7 : vector<2x32xf32>
    %9 = arith.addf %4, %8 : vector<2x32xf32>
    %c0_7 = arith.constant 0 : index
    %c0_8 = arith.constant 0 : index
    %10 = vector.load %arg5[%c0_7, %c0_8] : memref<1x32xf32, #tpu.memory_space<vmem>>, vector<1x32xf32>
    %11 = vector.broadcast %10 : vector<1x32xf32> to vector<2x32xf32>
    %12 = arith.addf %9, %11 : vector<2x32xf32>
    %cst_9 = arith.constant 0.000000e+00 : f32
    %13 = vector.broadcast %cst_9 : f32 to vector<2x32xf32>
    %14 = arith.maximumf %12, %13 : vector<2x32xf32>
    %15 = arith.truncf %14 : vector<2x32xf32> to vector<2x32xbf16>
    %c0_10 = arith.constant 0 : index
    %c0_11 = arith.constant 0 : index
    %16 = vector.load %arg6[%c0_10, %c0_11] : memref<32x128xbf16, #tpu.memory_space<vmem>>, vector<32x128xbf16>
    %cst_12 = arith.constant dense<0.000000e+00> : vector<2x128xf32>
    %17 = tpu.matmul %15, %16, %cst_12 {dimension_numbers = #tpu.dot_dimension_numbers<[1], [0], [0], [1], [0, 0, 1, 1], [], []>} : vector<2x32xbf16>, vector<32x128xbf16>, vector<2x128xf32> -> vector<2x128xf32>
    %c0_13 = arith.constant 0 : index
    %c0_14 = arith.constant 0 : index
    %18 = vector.load %arg7[%c0_13, %c0_14] : memref<1x128xf32, #tpu.memory_space<vmem>>, vector<1x128xf32>
    %19 = vector.broadcast %18 : vector<1x128xf32> to vector<2x128xf32>
    %20 = arith.addf %17, %19 : vector<2x128xf32>
    %21 = tpu.iota {dimensions = array<i32: 1>} : vector<2x128xi32>
    %c64_i32 = arith.constant 64 : i32
    %22 = vector.broadcast %c64_i32 : i32 to vector<2x128xi32>
    %23 = arith.cmpi slt, %21, %22 : vector<2x128xi32>
    %cst_15 = arith.constant 0xFF800000 : f32
    %24 = vector.broadcast %cst_15 : f32 to vector<2x128xf32>
    %25 = arith.select %23, %20, %24 : vector<2x128xi1>, vector<2x128xf32>
    %cst_16 = arith.constant dense<0xFF800000> : vector<2xf32>
    %26 = vector.multi_reduction <maximumf>, %25, %cst_16 [1] : vector<2x128xf32> to vector<2xf32>
    %27 = vector.shape_cast %26 : vector<2xf32> to vector<2x1xf32>
    %28 = vector.broadcast %27 : vector<2x1xf32> to vector<2x128xf32>
    %29 = arith.cmpf oeq, %25, %28 : vector<2x128xf32>
    %c128_i32 = arith.constant 128 : i32
    %30 = vector.broadcast %c128_i32 : i32 to vector<2x128xi32>
    %31 = arith.select %29, %21, %30 : vector<2x128xi1>, vector<2x128xi32>
    %cst_17 = arith.constant dense<2147483647> : vector<2xi32>
    %32 = vector.multi_reduction <minsi>, %31, %cst_17 [1] : vector<2x128xi32> to vector<2xi32>
    %33 = vector.shape_cast %32 : vector<2xi32> to vector<2x1xi32>
    %34 = arith.sitofp %33 : vector<2x1xi32> to vector<2x1xf32>
    %c65_i32 = arith.constant 65 : i32
    %35 = vector.broadcast %c65_i32 : i32 to vector<2x128xi32>
    %36 = arith.cmpi eq, %21, %35 : vector<2x128xi32>
    %37 = vector.shape_cast %34 : vector<2x1xf32> to vector<2x1xf32>
    %38 = vector.broadcast %37 : vector<2x1xf32> to vector<2x128xf32>
    %39 = arith.select %36, %38, %20 : vector<2x128xi1>, vector<2x128xf32>
    %40 = arith.truncf %39 : vector<2x128xf32> to vector<2x128xbf16>
    %c0_18 = arith.constant 0 : index
    %c0_19 = arith.constant 0 : index
    %41 = vector.load %arg8[%c0_18, %c0_19] : memref<2x128xbf16, #tpu.memory_space<vmem>>, vector<2x128xbf16>
    tpu.vector_store %arg8[%c0_18, %c0_19], %40 {strides = array<i32>} : memref<2x128xbf16, #tpu.memory_space<vmem>>, vector<2x128xbf16>,
    return
  }
  func.func @transform_0(%arg0: i32) -> (i32, i32) {
    %c0_i32 = arith.constant 0 : i32
    %c0_i32_0 = arith.constant 0 : i32
    return %arg0, %c0_i32 : i32, i32
  }
  func.func @transform_1(%arg0: i32) -> (i32, i32) {
    %c0_i32 = arith.constant 0 : i32
    %c0_i32_0 = arith.constant 0 : i32
    return %arg0, %c0_i32 : i32, i32
  }
  func.func @transform_2(%arg0: i32) -> (i32, i32) {
    %c0_i32 = arith.constant 0 : i32
    %c0_i32_0 = arith.constant 0 : i32
    %c0_i32_1 = arith.constant 0 : i32
    return %c0_i32, %c0_i32_0 : i32, i32
  }
  func.func @transform_3(%arg0: i32) -> (i32, i32) {
    %c0_i32 = arith.constant 0 : i32
    %c0_i32_0 = arith.constant 0 : i32
    %c0_i32_1 = arith.constant 0 : i32
    return %c0_i32, %c0_i32_0 : i32, i32
  }
  func.func @transform_4(%arg0: i32) -> (i32, i32) {
    %c0_i32 = arith.constant 0 : i32
    %c0_i32_0 = arith.constant 0 : i32
    %c0_i32_1 = arith.constant 0 : i32
    return %c0_i32, %c0_i32_0 : i32, i32
  }
  func.func @transform_5(%arg0: i32) -> (i32, i32) {
    %c0_i32 = arith.constant 0 : i32
    %c0_i32_0 = arith.constant 0 : i32
    %c0_i32_1 = arith.constant 0 : i32
    return %c0_i32, %c0_i32_0 : i32, i32
  }
  func.func @transform_6(%arg0: i32) -> (i32, i32) {
    %c0_i32 = arith.constant 0 : i32
    %c0_i32_0 = arith.constant 0 : i32
    %c0_i32_1 = arith.constant 0 : i32
    return %c0_i32, %c0_i32_0 : i32, i32
  }
  func.func @transform_7(%arg0: i32) -> (i32, i32) {
    %c0_i32 = arith.constant 0 : i32
    %c0_i32_0 = arith.constant 0 : i32
    return %arg0, %c0_i32 : i32, i32
  }
}

</mosaic_0001>

<bundles_post_ra>
// kernel: tpu_custom_call.1
= control target key start
LH: loop header
LB: loop body
LE: loop exit
PB: predicated region body
PF: predicated region fallthrough
CT: control target
= control target key end

     0   :  { %v415_v4 = vmov 0   ;;  %s529_s0 = inlined_call_operand.vmem [shape: f32[2,256], index: 0, kind: input, shape index: {}]   ;;  %s530_s1 = inlined_call_operand.vmem [shape: f32[2,1], index: 1, kind: input, shape index: {}]   ;;  %s531_s2 = inlined_call_operand.vmem [shape: bf16[256,32], index: 2, kind: input, shape index: {}]   ;;  %s532_s3 = inlined_call_operand.vmem [shape: f32[1,32], index: 3, kind: input, shape index: {}]   ;;  %s533_s4 = inlined_call_operand.vmem [shape: f32[1,32], index: 4, kind: input, shape index: {}]   ;;  %s534_s5 = inlined_call_operand.vmem [shape: bf16[32,128], index: 5, kind: input, shape index: {}]   ;;  %s535_s6 = inlined_call_operand.vmem [shape: f32[1,128], index: 6, kind: input, shape index: {}]   ;;  %s536_s7 = inlined_call_operand.hbm [shape: bf16[2,128], index: 7, kind: output, shape index: {}]  }
   0x1   :  { %v372_v0 = vld [vmem:[%s531_s2 + $0x38] sm:$0xff]  ;;  %v371_v2 = vld [vmem:[%s531_s2 + $0x30] sm:$0xff]  ;;  %385 = vset.pattern.permute.xlu0 %v415_v4  ;;  %v28_v5 = vld [vmem:[%s529_s0] sm:$0xf] }
   0x2   :  { %v380_v1 = vld [vmem:[%s531_s2 + $0x78] sm:$0xff]  ;;  %176 = vmatpush.bf16.msra.mxu0 %v372_v0  ;;  %v379_v3 = vld [vmem:[%s531_s2 + $0x70] sm:$0xff]  ;;  %v29_v6 = vld [vmem:[%s530_s1] sm:$0x3]  ;;  %31 = vst [vmem:[#allocation1] ss:$4 sm:$0xff] %v28_v5 }
   0x3   :  { %189 = vmatpush.bf16.msra.mxu1 %v380_v1  ;;  %v370_v7 = vld [vmem:[%s531_s2 + $0x28] sm:$0xff]  ;;  %73 = vperm.xlu0 %385, %v29_v6  }
   0x4   :  { %v378_v8 = vld [vmem:[%s531_s2 + $0x68] sm:$0xff] }
   0x6   :  { %177 = vmatpush.bf16.msra.mxu0 %v371_v2 }
   0x7   :  { %190 = vmatpush.bf16.msra.mxu1 %v379_v3 }
   0x8   :  { %12 = vsyncpa [#allocation3], 0  ;;  %v369_v9 = vld [vmem:[%s531_s2 + $0x20] sm:$0xff]  ;;  %v368_v11 = vld [vmem:[%s531_s2 + $0x18] sm:$0xff]  ;;  %vm229_vm0 = vcmask 261120   ;;  %v246_v38 = vlaneseq  ;;  %vm250_vm2 = vcmask 1041408  }
   0x9   :  { %v377_v10 = vld [vmem:[%s531_s2 + $0x60] sm:$0xff]  ;;  %v376_v12 = vld [vmem:[%s531_s2 + $0x58] sm:$0xff]  ;;  %v367_v13 = vld [vmem:[%s531_s2 + $0x10] sm:$0xff]  ;;  %s283_s19 = sshll.u32 %s536_s7, 4  ;;  %s284_s19 = int_to_ptr.hbm [resolvable:$true] %s283_s19 }
   0xa   :  { %178 = vmatpush.bf16.msra.mxu0 %v370_v7  ;;  %v375_v14 = vld [vmem:[%s531_s2 + $0x50] sm:$0xff]  ;;  %v366_v15 = vld [vmem:[%s531_s2 + $0x8] sm:$0xff]  ;;  %v365_v17 = vld [vmem:[%s531_s2] sm:$0xff]  ;;  %v247_v39 = vand.u32 127, %v246_v38 }
   0xb   :  { %191 = vmatpush.bf16.msra.mxu1 %v378_v8  ;;  %v374_v16 = vld [vmem:[%s531_s2 + $0x48] sm:$0xff]  ;;  %v373_v18 = vld [vmem:[%s531_s2 + $0x40] sm:$0xff] }
   0xc   :  { %v32_v19 = vld.sshfl [vmem:[#allocation1] sm:$0xff pattern:$0x73625140]  ;;  %v33_v20 = vld.sshfl [vmem:[#allocation1 + $0x8] sm:$0xff pattern:$0x73625140] }
   0xd   :  { %v36_v21 = vpack.c.bf16 %v32_v19, %v32_v19  ;;  %v37_v22 = vpack.c.bf16 %v33_v20, %v33_v20  ;;  %v382_v23 = vld [vmem:[%s534_s5 + $0x8] sm:$0xff]  ;;  %v381_v24 = vld [vmem:[%s534_s5] sm:$0xff]  ;;  %vm248_vm1 = vcmp.lt.s32.totalorder %v247_v39, 64  ;;  %vm272_vm5 = vcmp.eq.s32.totalorder %v247_v39, 65 }
   0xe   :  { %179 = vmatpush.bf16.msra.mxu0 %v369_v9  ;;  %239 = vmatpush.bf16.msra.mxu2 %v382_v23  ;;  %v386_v25 = vld [vmem:[%s532_s3] ss:$0 sm:$0xff] }
   0xf   :  { %192 = vmatpush.bf16.msra.mxu1 %v377_v10  ;;  %v387_v31 = vld [vmem:[%s533_s4] ss:$0 sm:$0xff]  ;;  %s416_s4 = smov [#allocation2]  }
  0x10   :  { %v388_v40 = vld [vmem:[%s535_s6] ss:$0 sm:$0xff]  ;;  %s281_s6 = sshll.u32 %s416_s4, 4  ;;  %s282_s6 = int_to_ptr.vmem [resolvable:$true] %s281_s6 }
  0x12   :  { %180 = vmatpush.bf16.msra.mxu0 %v368_v11  ;;  %240 = vmatpush.bf16.msra.mxu2 %v381_v24 }
  0x13   :  { %193 = vmatpush.bf16.msra.mxu1 %v376_v12 }
  0x16   :  { %181 = vmatpush.bf16.msra.mxu0 %v367_v13 }
  0x17   :  { %194 = vmatpush.bf16.msra.mxu1 %v375_v14 }
  0x1a   :  { %182 = vmatpush.bf16.msra.mxu0 %v366_v15 }
  0x1b   :  { %195 = vmatpush.bf16.msra.mxu1 %v374_v16 }
  0x1e   :  { %183 = vmatpush.bf16.msra.mxu0 %v365_v17 }
  0x1f   :  { %196 = vmatpush.bf16.msra.mxu1 %v373_v18 }
  0x21   :  { %184 = vmatmul.bf16.vlgmr.msra.gmra.mxu0 %v36_v21 }
  0x22   :  { %197 = vmatmul.bf16.vlgmr.msra.gmra.mxu1 %v37_v22 }
  0x75   :  { %v74_v26 = vpop.permute.xlu0 %73 }
  0x76   :  { %v79_v27 = vmul.f32 %v386_v25, %v74_v26 }
  0x9e   :  { %v185_v28 = vpop.f32.mrf.mxu0 }
  0x9f   :  { %v198_v29 = vpop.f32.mrf.mxu1  ;;  %v186_v30 = vadd.f32 %v185_v28, %v79_v27 }
  0xa1   :  { %v199_v32 = vadd.f32 %v198_v29, %v186_v30 }
  0xa3   :  { %v206_v33 = vadd.f32 %v387_v31, %v199_v32 }
  0xa5   :  { %v207_v34 = vmax.f32 %v206_v33, 0.0 }
  0xa6   :  { %v187_v35 = vpop.f32.mrf.mxu0 }
  0xa7   :  { %v200_v36 = vpop.f32.mrf.mxu1  ;;  %v208_v37 = vpack.c.bf16 %v207_v34, %v207_v34 }
  0xa9   :  { %364 = vmatmul.msk.bf16.vlgmr.msra.gmra.mxu2 %vm229_vm0, %v208_v37 }
 0x12c   :  { %v242_v41 = vpop.f32.mrf.mxu2 }
 0x12d   :  { %v243_v42 = vadd.f32 %v388_v40, %v242_v41 }
 0x12f   :  { %v249_v43 = vsel %vm248_vm1, %v243_v42, -inf }
 0x130   :  { %v251_v44 = vsel %vm250_vm2, %v249_v43, -inf }
 0x131   :  { %252 = vmax.xlane.f32.xlu0 %v251_v44 }
 0x134   :  { %v244_v45 = vpop.f32.mrf.mxu2 }
 0x1a4   :  { %v253_v46 = vpop.xlane.xlu0 %252 }
 0x1a5   :  { %vm254_vm3 = vcmp.eq.f32.partialorder %v249_v43, %v253_v46 }
 0x1a6   :  { %v255_v47 = vsel %vm254_vm3, %v247_v39, 128 }
 0x1a7   :  { %v256_v48 = vsel %vm250_vm2, %v255_v47, 2147483647 }
 0x1a8   :  { %v258_v49 = vshra.s32 %v256_v48, 16  ;;  %v257_v51 = vand.u32 65535, %v256_v48 }
 0x1aa   :  { %v260_v50 = vcvt.s32.f32 %v258_v49  ;;  %v259_v53 = vcvt.s32.f32 %v257_v51 }
 0x1ac   :  { %261 = vmin.xlane.f32.xlu1 %v260_v50 }
 0x21f   :  { %v262_v52 = vpop.xlane.xlu1 %261 }
 0x220   :  { %vm263_vm4 = vcmp.eq.f32.partialorder %v260_v50, %v262_v52  ;;  %v268_v55 = vcvt.f32.s32 %v262_v52 }
 0x221   :  { %v264_v54 = vsel %vm263_vm4, %v259_v53, inf }
 0x222   :  { %265 = vmin.xlane.f32.xlu1 %v264_v54  ;;  %v269_v57 = vshll.u32 %v268_v55, 16 }
 0x295   :  { %v266_v56 = vpop.xlane.xlu1 %265 }
 0x296   :  { %v267_v58 = vcvt.f32.s32 %v266_v56 }
 0x298   :  { %v270_v59 = vadd.s32 %v269_v57, %v267_v58 }
 0x29a   :  { %v271_v60 = vcvt.s32.f32 %v270_v59 }
 0x29c   :  { %v273_v61 = vsel %vm272_vm5, %v271_v60, %v243_v42 }
 0x29d   :  { %v274_v62 = vpack.c.bf16 %v273_v61, %v273_v61 }
 0x29f   :  { %275 = vst [vmem:[#allocation2] sm:$0x1] %v274_v62 }
 0x2a0   :  { %286 = dma.vmem_to_hbm [thread:$0]  %s282_s6, 16, %s284_s19, [#allocation3]  }
 0x2a1   :  { %413 = dma.done.wait [#allocation3], 16  }
 0x2a2   :  { %414 = vsyncadd [#allocation3], 4294967280 }
 0x2a3   :  { %291 = vsyncpa [#allocation3], 1 }

</bundles_post_ra>
